<compile_context>
chip_gen: v6e
topology: v6e:2x2x1
jax: 0.10.0
libtpu: 0.0.40
codegen_flags: <defaults>
</compile_context>

<pallas_src>
import functools
import math

import jax
import jax.numpy as jnp
from jax.experimental import pallas as pl
from jax.experimental.pallas import tpu as pltpu


GRID_SIZE = 1
SPLINE_ORDER = 2
GRID_RANGE = (-1.0, 1.0)
NUM_BASES = GRID_SIZE + SPLINE_ORDER            # K = 3


def _make_knots(grid_size=GRID_SIZE, spline_order=SPLINE_ORDER,
                grid_range=GRID_RANGE):
    h = (grid_range[1] - grid_range[0]) / grid_size
    return tuple(float(j) * h + grid_range[0]
                 for j in range(-spline_order, grid_size + spline_order + 1))


KNOTS = _make_knots()                    # (-5, -3, -1, 1, 3, 5)
KNOT_H = (GRID_RANGE[1] - GRID_RANGE[0]) / GRID_SIZE   # 2.0 (uniform spacing)


# ----------------------------------------------------------------------------
# Kernel helpers
# ----------------------------------------------------------------------------
def _bspline_bases(x):
    """K = 3 quadratic B-spline bases of x, shape-preserving (in, tb) arrays.

    Uniform knots are compile-time Python floats; Cox-de Boor denominators are
    pre-folded.  indicator*value products are fused into jnp.where selects and
    all affine ramps are expressed through the shared knot-unit variable
    u = (x - t0)/h so the recursion is a minimal number of VPU ops.
    """
    u = (x - KNOTS[0]) * (1.0 / KNOT_H)           # (x + 5) * 0.5
    zero = jnp.zeros_like(x)
    # Order-0 indicators (exactly the reference's half-open intervals).
    ind = [(x >= KNOTS[j]) & (x < KNOTS[j + 1]) for j in range(5)]
    # Order-1:  B1_j = I_j * (u - j) + I_{j+1} * ((j+2) - u)
    b1 = [jnp.where(ind[j], u - float(j), zero)
          + jnp.where(ind[j + 1], float(j + 2) - u, zero)
          for j in range(4)]
    # Order-2:  B2_j = 0.5 * ((u - j) * B1_j + ((j+3) - u) * B1_{j+1})
    b2 = [0.5 * ((u - float(j)) * b1[j] + (float(j + 3) - u) * b1[j + 1])
          for j in range(3)]
    return b2


def _kan_layer(h, w_ref):
    """One KanLinear layer in feature-major layout.

    h: (in, tb) f32 activations (batch on lanes).
    w_ref: either
      * (out, (K+1)*in) fused slab  = [W_base | W_spline_0 | ... | W_spline_K-1]
        -> single ((K+1)*in)-deep MXU matmul against the sublane-concatenated
           branches (used when in % 8 == 0, e.g. the 32-wide layers -> 128 deep)
      * (K+1, out, in) stacked slab -> K+1 accumulated small matmuls
        (used for the unaligned in=4 first layer).
    """
    branches = [jnp.maximum(h, 0.0)] + _bspline_bases(h)       # K+1 x (in, tb)
    if len(w_ref.shape) == 3:
        acc = jnp.dot(w_ref[0], branches[0],
                      preferred_element_type=jnp.float32)
        for k in range(1, NUM_BASES + 1):
            acc = acc + jnp.dot(w_ref[k], branches[k],
                                preferred_element_type=jnp.float32)
        return acc
    h_cat = jnp.concatenate(branches, axis=0)                  # ((K+1)*in, tb)
    return jnp.dot(w_ref[...], h_cat, preferred_element_type=jnp.float32)


def fused_kan_kernel(*refs):
    """refs = (x_ref, w_ref_layer0, ..., w_ref_layerL-1, o_ref); all feature-major."""
    x_ref, w_refs, o_ref = refs[0], refs[1:-1], refs[-1]
    h = x_ref[...]                                             # (in0, tb)
    for w_ref in w_refs:                                       # unrolled layers
        h = _kan_layer(h, w_ref)
    o_ref[...] = h.astype(o_ref.dtype)                         # (out_last, tb)


# ----------------------------------------------------------------------------
# Wrapper
# ----------------------------------------------------------------------------
def _choose_tiling(batch):
    """Returns (padded_batch, batch_tile).

    Tile capped at 512 (vreg/VMEM pressure); ragged batches padded to a lane
    multiple; >=2 grid steps whenever batch >= 256 (2-TC sharding on v7x).
    """
    if batch < 256:
        return batch, batch                       # single step; tiny problem
    padded = -(-batch // 128) * 128
    for tb in (512, 256, 128):
        if padded % tb == 0 and padded // tb >= 2:
            return padded, tb
    return padded, 128                            # unreachable, kept for safety


def integrated_brdf_kan_forward(weights, x, *, batch_tile=None):
    """weights: list of per-layer packed slabs (see make_kan_layer_weights).
    x: (B, in0) f32.  Returns (B,) when the final layer has out_features == 1.
    """
    batch, in0 = x.shape
    w_last = weights[-1]
    out_f = w_last.shape[0] if w_last.ndim == 2 else w_last.shape[1]

    if batch_tile is None:
        padded, tb = _choose_tiling(batch)
    else:
        tb = batch_tile
        padded = -(-batch // tb) * tb

    x_t = x.T                                                   # (in0, B)
    if padded != batch:
        x_t = jnp.pad(x_t, ((0, 0), (0, padded - batch)))

    in_specs = [pl.BlockSpec((in0, tb), lambda i: (0, i))]      # batch-tiled x
    for w in weights:                                           # weights resident
        in_specs.append(pl.BlockSpec(w.shape, lambda i, nd=w.ndim: (0,) * nd))

    out = pl.pallas_call(
        fused_kan_kernel,
        out_shape=jax.ShapeDtypeStruct((out_f, padded), jnp.float32),
        grid=(padded // tb,),
        in_specs=in_specs,
        out_specs=pl.BlockSpec((out_f, tb), lambda i: (0, i)),  # lane-dense rows
        compiler_params=pltpu.CompilerParams(
            dimension_semantics=("parallel",)),                 # 2-TC shard on v7x
    )(x_t, *weights)

    res = out[:, :batch]                                        # drop padding
    return res[0] if out_f == 1 else res.T                      # net(x).squeeze(1)


# ----------------------------------------------------------------------------
# Deterministic parameter construction (weights pre-packed for the kernel)
# ----------------------------------------------------------------------------
# TODO(synk): the PyTorch ResetParameters() spline init uses torch.linalg.lstsq
# (Curve2Coeff); init-time only, so the demo uses random weights with the same
# shapes — the forward-pass semantics are unchanged.
def make_kan_layer_weights(key, in_f, out_f):
    k1, k2, k3 = jax.random.split(key, 3)
    bound = 1.0 / math.sqrt(in_f)
    base_w = jax.random.uniform(k1, (out_f, in_f), jnp.float32, -bound, bound)
    spline_w = jax.random.uniform(k2, (out_f, in_f, NUM_BASES), jnp.float32,
                                  -0.1, 0.1)
    spline_scaler = jax.random.uniform(k3, (out_f, in_f), jnp.float32,
                                       -bound, bound)
    scaled_sw = spline_w * spline_scaler[:, :, None]            # (out, in, K)

    branches = [base_w] + [scaled_sw[:, :, k] for k in range(NUM_BASES)]
    if in_f % 8 == 0:
        # Fused slab: (out, (K+1)*in) -> one deep matmul against the
        # sublane-concatenated [relu(h), B0, B1, B2] activations.
        w_kernel = jnp.concatenate(branches, axis=1)
    else:
        # Unaligned in_features: stacked (K+1, out, in) for accumulated matmuls.
        w_kernel = jnp.stack(branches, axis=0)
    return w_kernel, (base_w, scaled_sw)


def make_network_weights(key, num_features):
    kernel_ws, ref_ws = [], []
    for i in range(len(num_features) - 1):
        key, sub = jax.random.split(key)
        w_all, ref_w = make_kan_layer_weights(sub, num_features[i],
                                              num_features[i + 1])
        kernel_ws.append(w_all)
        ref_ws.append(ref_w)
    return kernel_ws, ref_ws


# ----------------------------------------------------------------------------
# Pure-JAX reference (mirrors the PyTorch KanLinear forward exactly)
# ----------------------------------------------------------------------------
def _kan_linear_ref(x, base_w, scaled_sw):
    in_f = x.shape[1]
    grid = jnp.broadcast_to(jnp.asarray(KNOTS, jnp.float32)[None, :],
                            (in_f, len(KNOTS)))
    base_out = jnp.maximum(x, 0.0) @ base_w.T
    xe = x[:, :, None]
    bases = ((xe >= grid[None, :, :-1]) & (xe < grid[None, :, 1:])).astype(x.dtype)
    for k in range(1, SPLINE_ORDER + 1):
        bases = ((xe - grid[None, :, :-(k + 1)])
                 / (grid[None, :, k:-1] - grid[None, :, :-(k + 1)]) * bases[:, :, :-1]
                 + (grid[None, :, k + 1:] - xe)
                 / (grid[None, :, k + 1:] - grid[None, :, 1:-k]) * bases[:, :, 1:])
    spline_out = jnp.einsum("bik,oik->bo", bases, scaled_sw)
    return base_out + spline_out


def forward_ref(ref_ws, x):
    h = x
    for base_w, scaled_sw in ref_ws:
        h = _kan_linear_ref(h, base_w, scaled_sw)
    return jnp.squeeze(h, axis=1)


# ----------------------------------------------------------------------------
if __name__ == "__main__":
    # IntegratedBrdfKanNetwork(num_features=(4, 32, 32, 1)); batch of 16 samples.
    num_features = (4, 32, 32, 1)
    batch = 16

    key = jax.random.PRNGKey(0)
    key_x, key_p = jax.random.split(key)
    x = jax.random.uniform(key_x, (batch, num_features[0]), jnp.float32,
                           -1.0, 1.0)
    kernel_ws, ref_ws = make_network_weights(key_p, num_features)

    fwd = jax.jit(integrated_brdf_kan_forward)
    out = jax.block_until_ready(fwd(kernel_ws, x))

    ref = forward_ref(ref_ws, x)
    assert out.shape == (batch,), out.shape
    assert jnp.allclose(out, ref, atol=1e-4, rtol=1e-4), (out, ref)

    print("KERNEL_OK")
</pallas_src>

<mosaic_0001>
module attributes {stable_mosaic.version = 11 : i64} {
  func.func @fused_kan_kernel(%arg0: i32, %arg1: memref<4x16xf32, #tpu.memory_space<vmem>>, %arg2: memref<4x32x4xf32, #tpu.memory_space<vmem>>, %arg3: memref<32x128xf32, #tpu.memory_space<vmem>>, %arg4: memref<1x128xf32, #tpu.memory_space<vmem>>, %arg5: memref<1x16xf32, #tpu.memory_space<vmem>>) attributes {dimension_semantics = [#tpu.dimension_semantics<parallel>], iteration_bounds = array<i64: 1>, scalar_prefetch = 0 : i64, scratch_operands = 0 : i64, tpu.core_type = #tpu.core_type<tc>, window_params = [{transform_indices = @transform_0, window_bounds = array<i64: 4, 16>}, {pipeline_mode = #tpu.pipeline_mode<synchronous>, transform_indices = @transform_1, window_bounds = array<i64: 4, 32, 4>}, {pipeline_mode = #tpu.pipeline_mode<synchronous>, transform_indices = @transform_2, window_bounds = array<i64: 32, 128>}, {pipeline_mode = #tpu.pipeline_mode<synchronous>, transform_indices = @transform_3, window_bounds = array<i64: 1, 128>}, {transform_indices = @transform_4, window_bounds = array<i64: 1, 16>}]} {
    %c0 = arith.constant 0 : index
    %c0_0 = arith.constant 0 : index
    %0 = vector.load %arg1[%c0, %c0_0] : memref<4x16xf32, #tpu.memory_space<vmem>>, vector<4x16xf32>
    %cst = arith.constant 0.000000e+00 : f32
    %1 = vector.broadcast %cst : f32 to vector<4x16xf32>
    %2 = arith.maximumf %0, %1 : vector<4x16xf32>
    %cst_1 = arith.constant -5.000000e+00 : f32
    %3 = vector.broadcast %cst_1 : f32 to vector<4x16xf32>
    %4 = arith.subf %0, %3 : vector<4x16xf32>
    %cst_2 = arith.constant 5.000000e-01 : f32
    %5 = vector.broadcast %cst_2 : f32 to vector<4x16xf32>
    %6 = arith.mulf %4, %5 : vector<4x16xf32>
    %cst_3 = arith.constant 0.000000e+00 : f32
    %7 = vector.broadcast %cst_3 : f32 to vector<4x16xf32>
    %cst_4 = arith.constant -5.000000e+00 : f32
    %8 = vector.broadcast %cst_4 : f32 to vector<4x16xf32>
    %9 = arith.cmpf oge, %0, %8 : vector<4x16xf32>
    %cst_5 = arith.constant -3.000000e+00 : f32
    %10 = vector.broadcast %cst_5 : f32 to vector<4x16xf32>
    %11 = arith.cmpf olt, %0, %10 : vector<4x16xf32>
    %12 = arith.andi %9, %11 : vector<4x16xi1>
    %cst_6 = arith.constant -3.000000e+00 : f32
    %13 = vector.broadcast %cst_6 : f32 to vector<4x16xf32>
    %14 = arith.cmpf oge, %0, %13 : vector<4x16xf32>
    %cst_7 = arith.constant -1.000000e+00 : f32
    %15 = vector.broadcast %cst_7 : f32 to vector<4x16xf32>
    %16 = arith.cmpf olt, %0, %15 : vector<4x16xf32>
    %17 = arith.andi %14, %16 : vector<4x16xi1>
    %cst_8 = arith.constant -1.000000e+00 : f32
    %18 = vector.broadcast %cst_8 : f32 to vector<4x16xf32>
    %19 = arith.cmpf oge, %0, %18 : vector<4x16xf32>
    %cst_9 = arith.constant 1.000000e+00 : f32
    %20 = vector.broadcast %cst_9 : f32 to vector<4x16xf32>
    %21 = arith.cmpf olt, %0, %20 : vector<4x16xf32>
    %22 = arith.andi %19, %21 : vector<4x16xi1>
    %cst_10 = arith.constant 1.000000e+00 : f32
    %23 = vector.broadcast %cst_10 : f32 to vector<4x16xf32>
    %24 = arith.cmpf oge, %0, %23 : vector<4x16xf32>
    %cst_11 = arith.constant 3.000000e+00 : f32
    %25 = vector.broadcast %cst_11 : f32 to vector<4x16xf32>
    %26 = arith.cmpf olt, %0, %25 : vector<4x16xf32>
    %27 = arith.andi %24, %26 : vector<4x16xi1>
    %cst_12 = arith.constant 3.000000e+00 : f32
    %28 = vector.broadcast %cst_12 : f32 to vector<4x16xf32>
    %29 = arith.cmpf oge, %0, %28 : vector<4x16xf32>
    %cst_13 = arith.constant 5.000000e+00 : f32
    %30 = vector.broadcast %cst_13 : f32 to vector<4x16xf32>
    %31 = arith.cmpf olt, %0, %30 : vector<4x16xf32>
    %32 = arith.andi %29, %31 : vector<4x16xi1>
    %cst_14 = arith.constant 0.000000e+00 : f32
    %33 = vector.broadcast %cst_14 : f32 to vector<4x16xf32>
    %34 = arith.subf %6, %33 : vector<4x16xf32>
    %35 = arith.select %12, %34, %7 : vector<4x16xi1>, vector<4x16xf32>
    %cst_15 = arith.constant 2.000000e+00 : f32
    %36 = vector.broadcast %cst_15 : f32 to vector<4x16xf32>
    %37 = arith.subf %36, %6 : vector<4x16xf32>
    %38 = arith.select %17, %37, %7 : vector<4x16xi1>, vector<4x16xf32>
    %39 = arith.addf %35, %38 : vector<4x16xf32>
    %cst_16 = arith.constant 1.000000e+00 : f32
    %40 = vector.broadcast %cst_16 : f32 to vector<4x16xf32>
    %41 = arith.subf %6, %40 : vector<4x16xf32>
    %42 = arith.select %17, %41, %7 : vector<4x16xi1>, vector<4x16xf32>
    %cst_17 = arith.constant 3.000000e+00 : f32
    %43 = vector.broadcast %cst_17 : f32 to vector<4x16xf32>
    %44 = arith.subf %43, %6 : vector<4x16xf32>
    %45 = arith.select %22, %44, %7 : vector<4x16xi1>, vector<4x16xf32>
    %46 = arith.addf %42, %45 : vector<4x16xf32>
    %cst_18 = arith.constant 2.000000e+00 : f32
    %47 = vector.broadcast %cst_18 : f32 to vector<4x16xf32>
    %48 = arith.subf %6, %47 : vector<4x16xf32>
    %49 = arith.select %22, %48, %7 : vector<4x16xi1>, vector<4x16xf32>
    %cst_19 = arith.constant 4.000000e+00 : f32
    %50 = vector.broadcast %cst_19 : f32 to vector<4x16xf32>
    %51 = arith.subf %50, %6 : vector<4x16xf32>
    %52 = arith.select %27, %51, %7 : vector<4x16xi1>, vector<4x16xf32>
    %53 = arith.addf %49, %52 : vector<4x16xf32>
    %cst_20 = arith.constant 3.000000e+00 : f32
    %54 = vector.broadcast %cst_20 : f32 to vector<4x16xf32>
    %55 = arith.subf %6, %54 : vector<4x16xf32>
    %56 = arith.select %27, %55, %7 : vector<4x16xi1>, vector<4x16xf32>
    %cst_21 = arith.constant 5.000000e+00 : f32
    %57 = vector.broadcast %cst_21 : f32 to vector<4x16xf32>
    %58 = arith.subf %57, %6 : vector<4x16xf32>
    %59 = arith.select %32, %58, %7 : vector<4x16xi1>, vector<4x16xf32>
    %60 = arith.addf %56, %59 : vector<4x16xf32>
    %cst_22 = arith.constant 0.000000e+00 : f32
    %61 = vector.broadcast %cst_22 : f32 to vector<4x16xf32>
    %62 = arith.subf %6, %61 : vector<4x16xf32>
    %63 = arith.mulf %62, %39 : vector<4x16xf32>
    %cst_23 = arith.constant 3.000000e+00 : f32
    %64 = vector.broadcast %cst_23 : f32 to vector<4x16xf32>
    %65 = arith.subf %64, %6 : vector<4x16xf32>
    %66 = arith.mulf %65, %46 : vector<4x16xf32>
    %67 = arith.addf %63, %66 : vector<4x16xf32>
    %cst_24 = arith.constant 5.000000e-01 : f32
    %68 = vector.broadcast %cst_24 : f32 to vector<4x16xf32>
    %69 = arith.mulf %68, %67 : vector<4x16xf32>
    %cst_25 = arith.constant 1.000000e+00 : f32
    %70 = vector.broadcast %cst_25 : f32 to vector<4x16xf32>
    %71 = arith.subf %6, %70 : vector<4x16xf32>
    %72 = arith.mulf %71, %46 : vector<4x16xf32>
    %cst_26 = arith.constant 4.000000e+00 : f32
    %73 = vector.broadcast %cst_26 : f32 to vector<4x16xf32>
    %74 = arith.subf %73, %6 : vector<4x16xf32>
    %75 = arith.mulf %74, %53 : vector<4x16xf32>
    %76 = arith.addf %72, %75 : vector<4x16xf32>
    %cst_27 = arith.constant 5.000000e-01 : f32
    %77 = vector.broadcast %cst_27 : f32 to vector<4x16xf32>
    %78 = arith.mulf %77, %76 : vector<4x16xf32>
    %cst_28 = arith.constant 2.000000e+00 : f32
    %79 = vector.broadcast %cst_28 : f32 to vector<4x16xf32>
    %80 = arith.subf %6, %79 : vector<4x16xf32>
    %81 = arith.mulf %80, %53 : vector<4x16xf32>
    %cst_29 = arith.constant 5.000000e+00 : f32
    %82 = vector.broadcast %cst_29 : f32 to vector<4x16xf32>
    %83 = arith.subf %82, %6 : vector<4x16xf32>
    %84 = arith.mulf %83, %60 : vector<4x16xf32>
    %85 = arith.addf %81, %84 : vector<4x16xf32>
    %cst_30 = arith.constant 5.000000e-01 : f32
    %86 = vector.broadcast %cst_30 : f32 to vector<4x16xf32>
    %87 = arith.mulf %86, %85 : vector<4x16xf32>
    %c0_31 = arith.constant 0 : index
    %c0_32 = arith.constant 0 : index
    %c0_33 = arith.constant 0 : index
    %88 = vector.load %arg2[%c0_31, %c0_32, %c0_33] : memref<4x32x4xf32, #tpu.memory_space<vmem>>, vector<1x32x4xf32>
    %89 = vector.shape_cast %88 : vector<1x32x4xf32> to vector<32x4xf32>
    %cst_34 = arith.constant dense<0.000000e+00> : vector<32x16xf32>
    %90 = tpu.matmul %89, %2, %cst_34 {dimension_numbers = #tpu.dot_dimension_numbers<[1], [0], [0], [1], [0, 0, 1, 1], [], []>} : vector<32x4xf32>, vector<4x16xf32>, vector<32x16xf32> -> vector<32x16xf32>
    %c1 = arith.constant 1 : index
    %c0_35 = arith.constant 0 : index
    %c0_36 = arith.constant 0 : index
    %91 = vector.load %arg2[%c1, %c0_35, %c0_36] : memref<4x32x4xf32, #tpu.memory_space<vmem>>, vector<1x32x4xf32>
    %92 = vector.shape_cast %91 : vector<1x32x4xf32> to vector<32x4xf32>
    %cst_37 = arith.constant dense<0.000000e+00> : vector<32x16xf32>
    %93 = tpu.matmul %92, %69, %cst_37 {dimension_numbers = #tpu.dot_dimension_numbers<[1], [0], [0], [1], [0, 0, 1, 1], [], []>} : vector<32x4xf32>, vector<4x16xf32>, vector<32x16xf32> -> vector<32x16xf32>
    %94 = arith.addf %90, %93 : vector<32x16xf32>
    %c2 = arith.constant 2 : index
    %c0_38 = arith.constant 0 : index
    %c0_39 = arith.constant 0 : index
    %95 = vector.load %arg2[%c2, %c0_38, %c0_39] : memref<4x32x4xf32, #tpu.memory_space<vmem>>, vector<1x32x4xf32>
    %96 = vector.shape_cast %95 : vector<1x32x4xf32> to vector<32x4xf32>
    %cst_40 = arith.constant dense<0.000000e+00> : vector<32x16xf32>
    %97 = tpu.matmul %96, %78, %cst_40 {dimension_numbers = #tpu.dot_dimension_numbers<[1], [0], [0], [1], [0, 0, 1, 1], [], []>} : vector<32x4xf32>, vector<4x16xf32>, vector<32x16xf32> -> vector<32x16xf32>
    %98 = arith.addf %94, %97 : vector<32x16xf32>
    %c3 = arith.constant 3 : index
    %c0_41 = arith.constant 0 : index
    %c0_42 = arith.constant 0 : index
    %99 = vector.load %arg2[%c3, %c0_41, %c0_42] : memref<4x32x4xf32, #tpu.memory_space<vmem>>, vector<1x32x4xf32>
    %100 = vector.shape_cast %99 : vector<1x32x4xf32> to vector<32x4xf32>
    %cst_43 = arith.constant dense<0.000000e+00> : vector<32x16xf32>
    %101 = tpu.matmul %100, %87, %cst_43 {dimension_numbers = #tpu.dot_dimension_numbers<[1], [0], [0], [1], [0, 0, 1, 1], [], []>} : vector<32x4xf32>, vector<4x16xf32>, vector<32x16xf32> -> vector<32x16xf32>
    %102 = arith.addf %98, %101 : vector<32x16xf32>
    %cst_44 = arith.constant 0.000000e+00 : f32
    %103 = vector.broadcast %cst_44 : f32 to vector<32x16xf32>
    %104 = arith.maximumf %102, %103 : vector<32x16xf32>
    %cst_45 = arith.constant -5.000000e+00 : f32
    %105 = vector.broadcast %cst_45 : f32 to vector<32x16xf32>
    %106 = arith.subf %102, %105 : vector<32x16xf32>
    %cst_46 = arith.constant 5.000000e-01 : f32
    %107 = vector.broadcast %cst_46 : f32 to vector<32x16xf32>
    %108 = arith.mulf %106, %107 : vector<32x16xf32>
    %cst_47 = arith.constant 0.000000e+00 : f32
    %109 = vector.broadcast %cst_47 : f32 to vector<32x16xf32>
    %cst_48 = arith.constant -5.000000e+00 : f32
    %110 = vector.broadcast %cst_48 : f32 to vector<32x16xf32>
    %111 = arith.cmpf oge, %102, %110 : vector<32x16xf32>
    %cst_49 = arith.constant -3.000000e+00 : f32
    %112 = vector.broadcast %cst_49 : f32 to vector<32x16xf32>
    %113 = arith.cmpf olt, %102, %112 : vector<32x16xf32>
    %114 = arith.andi %111, %113 : vector<32x16xi1>
    %cst_50 = arith.constant -3.000000e+00 : f32
    %115 = vector.broadcast %cst_50 : f32 to vector<32x16xf32>
    %116 = arith.cmpf oge, %102, %115 : vector<32x16xf32>
    %cst_51 = arith.constant -1.000000e+00 : f32
    %117 = vector.broadcast %cst_51 : f32 to vector<32x16xf32>
    %118 = arith.cmpf olt, %102, %117 : vector<32x16xf32>
    %119 = arith.andi %116, %118 : vector<32x16xi1>
    %cst_52 = arith.constant -1.000000e+00 : f32
    %120 = vector.broadcast %cst_52 : f32 to vector<32x16xf32>
    %121 = arith.cmpf oge, %102, %120 : vector<32x16xf32>
    %cst_53 = arith.constant 1.000000e+00 : f32
    %122 = vector.broadcast %cst_53 : f32 to vector<32x16xf32>
    %123 = arith.cmpf olt, %102, %122 : vector<32x16xf32>
    %124 = arith.andi %121, %123 : vector<32x16xi1>
    %cst_54 = arith.constant 1.000000e+00 : f32
    %125 = vector.broadcast %cst_54 : f32 to vector<32x16xf32>
    %126 = arith.cmpf oge, %102, %125 : vector<32x16xf32>
    %cst_55 = arith.constant 3.000000e+00 : f32
    %127 = vector.broadcast %cst_55 : f32 to vector<32x16xf32>
    %128 = arith.cmpf olt, %102, %127 : vector<32x16xf32>
    %129 = arith.andi %126, %128 : vector<32x16xi1>
    %cst_56 = arith.constant 3.000000e+00 : f32
    %130 = vector.broadcast %cst_56 : f32 to vector<32x16xf32>
    %131 = arith.cmpf oge, %102, %130 : vector<32x16xf32>
    %cst_57 = arith.constant 5.000000e+00 : f32
    %132 = vector.broadcast %cst_57 : f32 to vector<32x16xf32>
    %133 = arith.cmpf olt, %102, %132 : vector<32x16xf32>
    %134 = arith.andi %131, %133 : vector<32x16xi1>
    %cst_58 = arith.constant 0.000000e+00 : f32
    %135 = vector.broadcast %cst_58 : f32 to vector<32x16xf32>
    %136 = arith.subf %108, %135 : vector<32x16xf32>
    %137 = arith.select %114, %136, %109 : vector<32x16xi1>, vector<32x16xf32>
    %cst_59 = arith.constant 2.000000e+00 : f32
    %138 = vector.broadcast %cst_59 : f32 to vector<32x16xf32>
    %139 = arith.subf %138, %108 : vector<32x16xf32>
    %140 = arith.select %119, %139, %109 : vector<32x16xi1>, vector<32x16xf32>
    %141 = arith.addf %137, %140 : vector<32x16xf32>
    %cst_60 = arith.constant 1.000000e+00 : f32
    %142 = vector.broadcast %cst_60 : f32 to vector<32x16xf32>
    %143 = arith.subf %108, %142 : vector<32x16xf32>
    %144 = arith.select %119, %143, %109 : vector<32x16xi1>, vector<32x16xf32>
    %cst_61 = arith.constant 3.000000e+00 : f32
    %145 = vector.broadcast %cst_61 : f32 to vector<32x16xf32>
    %146 = arith.subf %145, %108 : vector<32x16xf32>
    %147 = arith.select %124, %146, %109 : vector<32x16xi1>, vector<32x16xf32>
    %148 = arith.addf %144, %147 : vector<32x16xf32>
    %cst_62 = arith.constant 2.000000e+00 : f32
    %149 = vector.broadcast %cst_62 : f32 to vector<32x16xf32>
    %150 = arith.subf %108, %149 : vector<32x16xf32>
    %151 = arith.select %124, %150, %109 : vector<32x16xi1>, vector<32x16xf32>
    %cst_63 = arith.constant 4.000000e+00 : f32
    %152 = vector.broadcast %cst_63 : f32 to vector<32x16xf32>
    %153 = arith.subf %152, %108 : vector<32x16xf32>
    %154 = arith.select %129, %153, %109 : vector<32x16xi1>, vector<32x16xf32>
    %155 = arith.addf %151, %154 : vector<32x16xf32>
    %cst_64 = arith.constant 3.000000e+00 : f32
    %156 = vector.broadcast %cst_64 : f32 to vector<32x16xf32>
    %157 = arith.subf %108, %156 : vector<32x16xf32>
    %158 = arith.select %129, %157, %109 : vector<32x16xi1>, vector<32x16xf32>
    %cst_65 = arith.constant 5.000000e+00 : f32
    %159 = vector.broadcast %cst_65 : f32 to vector<32x16xf32>
    %160 = arith.subf %159, %108 : vector<32x16xf32>
    %161 = arith.select %134, %160, %109 : vector<32x16xi1>, vector<32x16xf32>
    %162 = arith.addf %158, %161 : vector<32x16xf32>
    %cst_66 = arith.constant 0.000000e+00 : f32
    %163 = vector.broadcast %cst_66 : f32 to vector<32x16xf32>
    %164 = arith.subf %108, %163 : vector<32x16xf32>
    %165 = arith.mulf %164, %141 : vector<32x16xf32>
    %cst_67 = arith.constant 3.000000e+00 : f32
    %166 = vector.broadcast %cst_67 : f32 to vector<32x16xf32>
    %167 = arith.subf %166, %108 : vector<32x16xf32>
    %168 = arith.mulf %167, %148 : vector<32x16xf32>
    %169 = arith.addf %165, %168 : vector<32x16xf32>
    %cst_68 = arith.constant 5.000000e-01 : f32
    %170 = vector.broadcast %cst_68 : f32 to vector<32x16xf32>
    %171 = arith.mulf %170, %169 : vector<32x16xf32>
    %cst_69 = arith.constant 1.000000e+00 : f32
    %172 = vector.broadcast %cst_69 : f32 to vector<32x16xf32>
    %173 = arith.subf %108, %172 : vector<32x16xf32>
    %174 = arith.mulf %173, %148 : vector<32x16xf32>
    %cst_70 = arith.constant 4.000000e+00 : f32
    %175 = vector.broadcast %cst_70 : f32 to vector<32x16xf32>
    %176 = arith.subf %175, %108 : vector<32x16xf32>
    %177 = arith.mulf %176, %155 : vector<32x16xf32>
    %178 = arith.addf %174, %177 : vector<32x16xf32>
    %cst_71 = arith.constant 5.000000e-01 : f32
    %179 = vector.broadcast %cst_71 : f32 to vector<32x16xf32>
    %180 = arith.mulf %179, %178 : vector<32x16xf32>
    %cst_72 = arith.constant 2.000000e+00 : f32
    %181 = vector.broadcast %cst_72 : f32 to vector<32x16xf32>
    %182 = arith.subf %108, %181 : vector<32x16xf32>
    %183 = arith.mulf %182, %155 : vector<32x16xf32>
    %cst_73 = arith.constant 5.000000e+00 : f32
    %184 = vector.broadcast %cst_73 : f32 to vector<32x16xf32>
    %185 = arith.subf %184, %108 : vector<32x16xf32>
    %186 = arith.mulf %185, %162 : vector<32x16xf32>
    %187 = arith.addf %183, %186 : vector<32x16xf32>
    %cst_74 = arith.constant 5.000000e-01 : f32
    %188 = vector.broadcast %cst_74 : f32 to vector<32x16xf32>
    %189 = arith.mulf %188, %187 : vector<32x16xf32>
    %190 = tpu.concatenate %104, %171, %180, %189 in 0 : vector<32x16xf32>, vector<32x16xf32>, vector<32x16xf32>, vector<32x16xf32> -> vector<128x16xf32>
    %c0_75 = arith.constant 0 : index
    %c0_76 = arith.constant 0 : index
    %191 = vector.load %arg3[%c0_75, %c0_76] : memref<32x128xf32, #tpu.memory_space<vmem>>, vector<32x128xf32>
    %cst_77 = arith.constant dense<0.000000e+00> : vector<32x16xf32>
    %192 = tpu.matmul %191, %190, %cst_77 {dimension_numbers = #tpu.dot_dimension_numbers<[1], [0], [0], [1], [0, 0, 1, 1], [], []>} : vector<32x128xf32>, vector<128x16xf32>, vector<32x16xf32> -> vector<32x16xf32>
    %cst_78 = arith.constant 0.000000e+00 : f32
    %193 = vector.broadcast %cst_78 : f32 to vector<32x16xf32>
    %194 = arith.maximumf %192, %193 : vector<32x16xf32>
    %cst_79 = arith.constant -5.000000e+00 : f32
    %195 = vector.broadcast %cst_79 : f32 to vector<32x16xf32>
    %196 = arith.subf %192, %195 : vector<32x16xf32>
    %cst_80 = arith.constant 5.000000e-01 : f32
    %197 = vector.broadcast %cst_80 : f32 to vector<32x16xf32>
    %198 = arith.mulf %196, %197 : vector<32x16xf32>
    %cst_81 = arith.constant 0.000000e+00 : f32
    %199 = vector.broadcast %cst_81 : f32 to vector<32x16xf32>
    %cst_82 = arith.constant -5.000000e+00 : f32
    %200 = vector.broadcast %cst_82 : f32 to vector<32x16xf32>
    %201 = arith.cmpf oge, %192, %200 : vector<32x16xf32>
    %cst_83 = arith.constant -3.000000e+00 : f32
    %202 = vector.broadcast %cst_83 : f32 to vector<32x16xf32>
    %203 = arith.cmpf olt, %192, %202 : vector<32x16xf32>
    %204 = arith.andi %201, %203 : vector<32x16xi1>
    %cst_84 = arith.constant -3.000000e+00 : f32
    %205 = vector.broadcast %cst_84 : f32 to vector<32x16xf32>
    %206 = arith.cmpf oge, %192, %205 : vector<32x16xf32>
    %cst_85 = arith.constant -1.000000e+00 : f32
    %207 = vector.broadcast %cst_85 : f32 to vector<32x16xf32>
    %208 = arith.cmpf olt, %192, %207 : vector<32x16xf32>
    %209 = arith.andi %206, %208 : vector<32x16xi1>
    %cst_86 = arith.constant -1.000000e+00 : f32
    %210 = vector.broadcast %cst_86 : f32 to vector<32x16xf32>
    %211 = arith.cmpf oge, %192, %210 : vector<32x16xf32>
    %cst_87 = arith.constant 1.000000e+00 : f32
    %212 = vector.broadcast %cst_87 : f32 to vector<32x16xf32>
    %213 = arith.cmpf olt, %192, %212 : vector<32x16xf32>
    %214 = arith.andi %211, %213 : vector<32x16xi1>
    %cst_88 = arith.constant 1.000000e+00 : f32
    %215 = vector.broadcast %cst_88 : f32 to vector<32x16xf32>
    %216 = arith.cmpf oge, %192, %215 : vector<32x16xf32>
    %cst_89 = arith.constant 3.000000e+00 : f32
    %217 = vector.broadcast %cst_89 : f32 to vector<32x16xf32>
    %218 = arith.cmpf olt, %192, %217 : vector<32x16xf32>
    %219 = arith.andi %216, %218 : vector<32x16xi1>
    %cst_90 = arith.constant 3.000000e+00 : f32
    %220 = vector.broadcast %cst_90 : f32 to vector<32x16xf32>
    %221 = arith.cmpf oge, %192, %220 : vector<32x16xf32>
    %cst_91 = arith.constant 5.000000e+00 : f32
    %222 = vector.broadcast %cst_91 : f32 to vector<32x16xf32>
    %223 = arith.cmpf olt, %192, %222 : vector<32x16xf32>
    %224 = arith.andi %221, %223 : vector<32x16xi1>
    %cst_92 = arith.constant 0.000000e+00 : f32
    %225 = vector.broadcast %cst_92 : f32 to vector<32x16xf32>
    %226 = arith.subf %198, %225 : vector<32x16xf32>
    %227 = arith.select %204, %226, %199 : vector<32x16xi1>, vector<32x16xf32>
    %cst_93 = arith.constant 2.000000e+00 : f32
    %228 = vector.broadcast %cst_93 : f32 to vector<32x16xf32>
    %229 = arith.subf %228, %198 : vector<32x16xf32>
    %230 = arith.select %209, %229, %199 : vector<32x16xi1>, vector<32x16xf32>
    %231 = arith.addf %227, %230 : vector<32x16xf32>
    %cst_94 = arith.constant 1.000000e+00 : f32
    %232 = vector.broadcast %cst_94 : f32 to vector<32x16xf32>
    %233 = arith.subf %198, %232 : vector<32x16xf32>
    %234 = arith.select %209, %233, %199 : vector<32x16xi1>, vector<32x16xf32>
    %cst_95 = arith.constant 3.000000e+00 : f32
    %235 = vector.broadcast %cst_95 : f32 to vector<32x16xf32>
    %236 = arith.subf %235, %198 : vector<32x16xf32>
    %237 = arith.select %214, %236, %199 : vector<32x16xi1>, vector<32x16xf32>
    %238 = arith.addf %234, %237 : vector<32x16xf32>
    %cst_96 = arith.constant 2.000000e+00 : f32
    %239 = vector.broadcast %cst_96 : f32 to vector<32x16xf32>
    %240 = arith.subf %198, %239 : vector<32x16xf32>
    %241 = arith.select %214, %240, %199 : vector<32x16xi1>, vector<32x16xf32>
    %cst_97 = arith.constant 4.000000e+00 : f32
    %242 = vector.broadcast %cst_97 : f32 to vector<32x16xf32>
    %243 = arith.subf %242, %198 : vector<32x16xf32>
    %244 = arith.select %219, %243, %199 : vector<32x16xi1>, vector<32x16xf32>
    %245 = arith.addf %241, %244 : vector<32x16xf32>
    %cst_98 = arith.constant 3.000000e+00 : f32
    %246 = vector.broadcast %cst_98 : f32 to vector<32x16xf32>
    %247 = arith.subf %198, %246 : vector<32x16xf32>
    %248 = arith.select %219, %247, %199 : vector<32x16xi1>, vector<32x16xf32>
    %cst_99 = arith.constant 5.000000e+00 : f32
    %249 = vector.broadcast %cst_99 : f32 to vector<32x16xf32>
    %250 = arith.subf %249, %198 : vector<32x16xf32>
    %251 = arith.select %224, %250, %199 : vector<32x16xi1>, vector<32x16xf32>
    %252 = arith.addf %248, %251 : vector<32x16xf32>
    %cst_100 = arith.constant 0.000000e+00 : f32
    %253 = vector.broadcast %cst_100 : f32 to vector<32x16xf32>
    %254 = arith.subf %198, %253 : vector<32x16xf32>
    %255 = arith.mulf %254, %231 : vector<32x16xf32>
    %cst_101 = arith.constant 3.000000e+00 : f32
    %256 = vector.broadcast %cst_101 : f32 to vector<32x16xf32>
    %257 = arith.subf %256, %198 : vector<32x16xf32>
    %258 = arith.mulf %257, %238 : vector<32x16xf32>
    %259 = arith.addf %255, %258 : vector<32x16xf32>
    %cst_102 = arith.constant 5.000000e-01 : f32
    %260 = vector.broadcast %cst_102 : f32 to vector<32x16xf32>
    %261 = arith.mulf %260, %259 : vector<32x16xf32>
    %cst_103 = arith.constant 1.000000e+00 : f32
    %262 = vector.broadcast %cst_103 : f32 to vector<32x16xf32>
    %263 = arith.subf %198, %262 : vector<32x16xf32>
    %264 = arith.mulf %263, %238 : vector<32x16xf32>
    %cst_104 = arith.constant 4.000000e+00 : f32
    %265 = vector.broadcast %cst_104 : f32 to vector<32x16xf32>
    %266 = arith.subf %265, %198 : vector<32x16xf32>
    %267 = arith.mulf %266, %245 : vector<32x16xf32>
    %268 = arith.addf %264, %267 : vector<32x16xf32>
    %cst_105 = arith.constant 5.000000e-01 : f32
    %269 = vector.broadcast %cst_105 : f32 to vector<32x16xf32>
    %270 = arith.mulf %269, %268 : vector<32x16xf32>
    %cst_106 = arith.constant 2.000000e+00 : f32
    %271 = vector.broadcast %cst_106 : f32 to vector<32x16xf32>
    %272 = arith.subf %198, %271 : vector<32x16xf32>
    %273 = arith.mulf %272, %245 : vector<32x16xf32>
    %cst_107 = arith.constant 5.000000e+00 : f32
    %274 = vector.broadcast %cst_107 : f32 to vector<32x16xf32>
    %275 = arith.subf %274, %198 : vector<32x16xf32>
    %276 = arith.mulf %275, %252 : vector<32x16xf32>
    %277 = arith.addf %273, %276 : vector<32x16xf32>
    %cst_108 = arith.constant 5.000000e-01 : f32
    %278 = vector.broadcast %cst_108 : f32 to vector<32x16xf32>
    %279 = arith.mulf %278, %277 : vector<32x16xf32>
    %280 = tpu.concatenate %194, %261, %270, %279 in 0 : vector<32x16xf32>, vector<32x16xf32>, vector<32x16xf32>, vector<32x16xf32> -> vector<128x16xf32>
    %c0_109 = arith.constant 0 : index
    %c0_110 = arith.constant 0 : index
    %281 = vector.load %arg4[%c0_109, %c0_110] : memref<1x128xf32, #tpu.memory_space<vmem>>, vector<1x128xf32>
    %cst_111 = arith.constant dense<0.000000e+00> : vector<1x16xf32>
    %282 = tpu.matmul %281, %280, %cst_111 {dimension_numbers = #tpu.dot_dimension_numbers<[1], [0], [0], [1], [0, 0, 1, 1], [], []>} : vector<1x128xf32>, vector<128x16xf32>, vector<1x16xf32> -> vector<1x16xf32>
    %c0_112 = arith.constant 0 : index
    %c0_113 = arith.constant 0 : index
    %283 = vector.load %arg5[%c0_112, %c0_113] : memref<1x16xf32, #tpu.memory_space<vmem>>, vector<1x16xf32>
    tpu.vector_store %arg5[%c0_112, %c0_113], %282 {strides = array<i32>} : memref<1x16xf32, #tpu.memory_space<vmem>>, vector<1x16xf32>,
    return
  }
  func.func @transform_0(%arg0: i32) -> (i32, i32) {
    %c0_i32 = arith.constant 0 : i32
    %c0_i32_0 = arith.constant 0 : i32
    return %c0_i32, %arg0 : i32, i32
  }
  func.func @transform_1(%arg0: i32) -> (i32, i32, i32) {
    %c0_i32 = arith.constant 0 : i32
    %c0_i32_0 = arith.constant 0 : i32
    %c0_i32_1 = arith.constant 0 : i32
    %c0_i32_2 = arith.constant 0 : i32
    return %c0_i32, %c0_i32_0, %c0_i32_1 : i32, i32, i32
  }
  func.func @transform_2(%arg0: i32) -> (i32, i32) {
    %c0_i32 = arith.constant 0 : i32
    %c0_i32_0 = arith.constant 0 : i32
    %c0_i32_1 = arith.constant 0 : i32
    return %c0_i32, %c0_i32_0 : i32, i32
  }
  func.func @transform_3(%arg0: i32) -> (i32, i32) {
    %c0_i32 = arith.constant 0 : i32
    %c0_i32_0 = arith.constant 0 : i32
    %c0_i32_1 = arith.constant 0 : i32
    return %c0_i32, %c0_i32_0 : i32, i32
  }
  func.func @transform_4(%arg0: i32) -> (i32, i32) {
    %c0_i32 = arith.constant 0 : i32
    %c0_i32_0 = arith.constant 0 : i32
    return %c0_i32, %arg0 : i32, i32
  }
}

</mosaic_0001>

<bundles_post_ra>
// kernel: integrated_brdf_kan_forward.1
= control target key start
LH: loop header
LB: loop body
LE: loop exit
PB: predicated region body
PF: predicated region fallthrough
CT: control target
= control target key end

     0   :  { %vm90_vm0 = vcmask 1043456   ;;  %vm77_vm1 = vcmask 31744   ;;  %s2013_s0 = inlined_call_operand.vmem [shape: f32[4,16], index: 0, kind: input, shape index: {}]   ;;  %s2014_s1 = inlined_call_operand.vmem [shape: f32[4,32,4], index: 1, kind: input, shape index: {}]   ;;  %s2015_s2 = inlined_call_operand.vmem [shape: f32[32,128], index: 2, kind: input, shape index: {}]   ;;  %s2016_s3 = inlined_call_operand.vmem [shape: f32[1,128], index: 3, kind: input, shape index: {}]   ;;  %s2017_s4 = inlined_call_operand.hbm [shape: f32[1,16], index: 4, kind: output, shape index: {}]  }
   0x1   :  { %v18_v0 = vld [vmem:[%s2013_s0] sm:$0xf]  ;;  %v69_v9 = vld [vmem:[%s2014_s1 + $0x8] sm:$0xff]  ;;  %v70_v15 = vld [vmem:[%s2014_s1 + $0x10] sm:$0xff] }
   0x2   :  { %v1069_v1 = vld [vmem:[%s2014_s1 + $0x20] sm:$0xff]  ;;  %v1065_v3 = vadd.f32 5.0, %v18_v0  ;;  %vm22_vm2 = vcmp.ge.f32.partialorder %v18_v0, -5.0  ;;  %vm23_vm3 = vcmp.lt.f32.partialorder %v18_v0, -3.0  ;;  %vm25_vm4 = vcmp.ge.f32.partialorder %v18_v0, -3.0  ;;  %v71_v28 = vld [vmem:[%s2014_s1 + $0x18] sm:$0xff] }
   0x3   :  { %v68_v2 = vld [vmem:[%s2014_s1] sm:$0xff]  ;;  %1192 = vmatprep.mubr.msk.f32.mxu0 %vm77_vm1, %v1069_v1  ;;  %vm1359_vm5 = vmand %vm22_vm2, %vm23_vm3  ;;  %vm26_vm6 = vcmp.lt.f32.partialorder %v18_v0, -1.0  ;;  %vm28_vm7 = vcmp.ge.f32.partialorder %v18_v0, -1.0  ;;  %vm29_vm8 = vcmp.lt.f32.partialorder %v18_v0, 1.0  ;;  %vm31_vm9 = vcmp.ge.f32.partialorder %v18_v0, 1.0 }
   0x4   :  { %1200 = vmatprep.mubr.msk.f32.mxu1 %vm77_vm1, %v68_v2  ;;  %v21_v5 = vmul.f32 0.5, %v1065_v3  ;;  %vm1363_vm10 = vmand %vm25_vm4, %vm26_vm6  ;;  %vm32_vm11 = vcmp.lt.f32.partialorder %v18_v0, 3.0  ;;  %v19_v7 = vmax.f32 %v18_v0, 0.0  ;;  %vm34_vm12 = vcmp.ge.f32.partialorder %v18_v0, 3.0 }
   0x5   :  { %vm1367_vm13 = vmand %vm28_vm7, %vm29_vm8  ;;  %vm35_vm14 = vcmp.lt.f32.partialorder %v18_v0, 5.0 }
   0x6   :  { %vm1374_vm15 = vmand %vm31_vm9, %vm32_vm11  ;;  %v37_v11 = vsel %vm1359_vm5, %v21_v5, 0.0  ;;  %v38_v12 = vsub.f32 2.0, %v21_v5  ;;  %v1066_v13 = vadd.f32 -1.0, %v21_v5  ;;  %v43_v14 = vsub.f32 3.0, %v21_v5  ;;  %1198 = vmatprep.subr.msk.mxu1 %vm90_vm0, %v19_v7 }
   0x7   :  { %v1067_v16 = vadd.f32 -2.0, %v21_v5  ;;  %v48_v17 = vsub.f32 4.0, %v21_v5  ;;  %1199 = vmatpush3.msk.msra.mxu1 %vm90_vm0, %v19_v7  ;;  %vm1385_vm2 = vmand %vm34_vm12, %vm35_vm14  ;;  %v1068_v19 = vadd.f32 -3.0, %v21_v5  ;;  %v53_v20 = vsub.f32 5.0, %v21_v5 }
   0x8   :  { %v39_v21 = vsel %vm1363_vm10, %v38_v12, 0.0  ;;  %v42_v22 = vsel %vm1363_vm10, %v1066_v13, 0.0  ;;  %v44_v23 = vsel %vm1367_vm13, %v43_v14, 0.0  ;;  %1201 = vmatmul.mubr.msk.f32.vlgmr.msra.gmra.mxu1 %vm77_vm1, %v69_v9 }
   0x9   :  { %v40_v24 = vadd.f32 %v39_v21, %v37_v11  ;;  %v45_v25 = vadd.f32 %v44_v23, %v42_v22  ;;  %v47_v26 = vsel %vm1367_vm13, %v1067_v16, 0.0  ;;  %v49_v27 = vsel %vm1374_vm15, %v48_v17, 0.0  ;;  %1203 = vmatprep.mubr.msk.f32.mxu1 %vm77_vm1, %v70_v15 }
   0xa   :  { %9 = vsyncpa [#allocation3], 0  ;;  %v50_v29 = vadd.f32 %v49_v27, %v47_v26  ;;  %v52_v30 = vsel %vm1374_vm15, %v1068_v19, 0.0  ;;  %v54_v31 = vsel %vm1385_vm2, %v53_v20, 0.0  ;;  %v1092_v32 = vld [vmem:[%s2014_s1 + $0x60] sm:$0xff]  ;;  %v1070_v44 = vld [vmem:[%s2014_s1 + $0x28] sm:$0xff] }
   0xb   :  { %v56_v33 = vmul.f32 %v40_v24, %v21_v5  ;;  %v57_v34 = vmul.f32 %v45_v25, %v43_v14  ;;  %v60_v35 = vmul.f32 %v1066_v13, %v45_v25  ;;  %v55_v36 = vadd.f32 %v54_v31, %v52_v30  ;;  %v1071_v47 = vld [vmem:[%s2014_s1 + $0x30] sm:$0xff]  ;;  %v1093_v48 = vld [vmem:[%s2014_s1 + $0x68] sm:$0xff]  ;;  %v1072_v49 = vld [vmem:[%s2014_s1 + $0x38] sm:$0xff]  ;;  %s1322_s29 = smov [#allocation2]  }
   0xc   :  { %v61_v37 = vmul.f32 %v50_v29, %v48_v17  ;;  %v64_v38 = vmul.f32 %v1067_v16, %v50_v29  ;;  %1204 = vmatmul.mubr.msk.f32.gmra.mxu1 %vm77_vm1, %v71_v28  ;;  %v1094_v50 = vld [vmem:[%s2014_s1 + $0x70] sm:$0xff]  ;;  %v1083_v51 = vld [vmem:[%s2014_s1 + $0x40] sm:$0xff]  ;;  %v1095_v52 = vld [vmem:[%s2014_s1 + $0x78] sm:$0xff]  ;;  %s1057_s30 = sshll.u32 %s1322_s29, 4  ;;  %s1058_s30 = int_to_ptr.vmem [resolvable:$true] %s1057_s30 }
   0xd   :  { %v58_v39 = vadd.f32 %v57_v34, %v56_v33  ;;  %v65_v40 = vmul.f32 %v55_v36, %v53_v20  ;;  %1216 = vmatprep.mubr.msk.f32.mxu1 %vm77_vm1, %v1092_v32  ;;  %v1084_v53 = vld [vmem:[%s2014_s1 + $0x48] sm:$0xff]  ;;  %v1085_v54 = vld [vmem:[%s2014_s1 + $0x50] sm:$0xff]  ;;  %v1086_v55 = vld [vmem:[%s2014_s1 + $0x58] sm:$0xff]  ;;  %s1298_s5 = scalar_lea.vmem %s1058_s30, 16  ;;  %s1302_s6 = scalar_lea.vmem %s1058_s30, 32 }
   0xe   :  { %v62_v41 = vadd.f32 %v61_v37, %v60_v35  ;;  %v693_v56 = vld [vmem:[%s2015_s2] sm:$0xff]  ;;  %p1299_p0 = scmp.ne.s32.totalorder %s1058_s30, %s1298_s5  ;;  %p1303_p1 = scmp.lt.s32.totalorder %s1058_s30, %s1058_s30 }
   0xf   :  { %v59_v42 = vmul.f32 0.5, %v58_v39  ;;  %v66_v43 = vadd.f32 %v65_v40, %v64_v38  ;;  %p1304_p2 = scmp.lt.s32.totalorder %s1302_s6, %s1298_s5 }
  0x10   :  { %v63_v45 = vmul.f32 0.5, %v62_v41 }
  0x11   :  { %1190 = vmatprep.subr.msk.mxu0 %vm90_vm0, %v59_v42  ;;  %v67_v46 = vmul.f32 0.5, %v66_v43  ;;  %p1305_p3 = por %p1304_p2, %p1303_p1 }
  0x12   :  { %1191 = vmatpush3.msk.msra.mxu0 %vm90_vm0, %v59_v42 }
  0x13   :  { %1193 = vmatmul.mubr.msk.f32.vlgmr.msra.gmra.mxu0 %vm77_vm1, %v1070_v44  ;;  %1206 = vmatprep.subr.msk.mxu0 %vm90_vm0, %v63_v45  ;;  %p1306_p4 = pnand %p1305_p3, %p1299_p0 }
  0x14   :  { %1207 = vmatpush3.msk.msra.mxu0 %vm90_vm0, %v63_v45  ;;  %1214 = vmatprep.subr.msk.mxu1 %vm90_vm0, %v67_v46 }
  0x15   :  { %1195 = vmatprep.mubr.msk.f32.mxu0 %vm77_vm1, %v1071_v47  ;;  %1215 = vmatpush3.msk.msra.mxu1 %vm90_vm0, %v67_v46 }
  0x16   :  { %1217 = vmatmul.mubr.msk.f32.vlgmr.msra.gmra.mxu1 %vm77_vm1, %v1093_v48 }
  0x17   :  { %1196 = vmatmul.mubr.msk.f32.gmra.mxu0 %vm77_vm1, %v1072_v49  ;;  %1219 = vmatprep.mubr.msk.f32.mxu1 %vm77_vm1, %v1094_v50 }
  0x18   :  { %1208 = vmatprep.mubr.msk.f32.mxu0 %vm77_vm1, %v1083_v51 }
  0x1a   :  { %1220 = vmatmul.mubr.msk.f32.gmra.mxu1 %vm77_vm1, %v1095_v52 }
  0x1b   :  { %1209 = vmatmul.mubr.msk.f32.vlgmr.msra.gmra.mxu0 %vm77_vm1, %v1084_v53 }
  0x1c   :  { %1211 = vmatprep.mubr.msk.f32.mxu0 %vm77_vm1, %v1085_v54 }
  0x1f   :  { %1212 = vmatmul.mubr.msk.f32.gmra.mxu0 %vm77_vm1, %v1086_v55 }
  0x20   :  { %1254 = vmatprep.mubr.f32.mxu0 %v693_v56 }
  0xc8   :  { %v1202_v57 = vpop.f32.mrf.mxu1 }
  0xca   :  { %v260_v58 = vpop.f32.mrf.mxu1 }
  0xcc   :  { %v1205_v59 = vpop.f32.mrf.mxu1 }
  0xce   :  { %v270_v61 = vpop.f32.mrf.mxu1 }
  0xd3   :  { %v1194_v60 = vpop.f32.mrf.mxu0 }
  0xd4   :  { %v266_v2 = vadd.f32 %v1202_v57, %v1194_v60 }
  0xd5   :  { %v160_v62 = vpop.f32.mrf.mxu0 }
  0xd6   :  { %v1218_v0 = vpop.f32.mrf.mxu1  ;;  %v261_v5 = vadd.f32 %v260_v58, %v160_v62 }
  0xd7   :  { %v1197_v63 = vpop.f32.mrf.mxu0 }
  0xd8   :  { %v474_v4 = vpop.f32.mrf.mxu1  ;;  %v276_v8 = vadd.f32 %v1205_v59, %v1197_v63 }
  0xd9   :  { %v170_v1 = vpop.f32.mrf.mxu0 }
  0xda   :  { %v1221_v12 = vpop.f32.mrf.mxu1  ;;  %v271_v13 = vadd.f32 %v270_v61, %v170_v1 }
  0xdb   :  { %v1210_v3 = vpop.f32.mrf.mxu0 }
  0xdc   :  { %v385_v6 = vadd.f32 %v1210_v3, %v266_v2  ;;  %v484_v20 = vpop.f32.mrf.mxu1 }
  0xdd   :  { %v365_v7 = vpop.f32.mrf.mxu0 }
  0xde   :  { %v1462_v9 = vadd.f32 %v1218_v0, %v385_v6  ;;  %v384_v10 = vadd.f32 %v365_v7, %v261_v5 }
  0xdf   :  { %v1213_v11 = vpop.f32.mrf.mxu0 }
  0xe0   :  { %v1464_v14 = vadd.f32 %v474_v4, %v384_v10  ;;  %v387_v15 = vadd.f32 %v1213_v11, %v276_v8  ;;  %v1102_v16 = vadd.f32 5.0, %v1462_v9  ;;  %vm534_vm0 = vcmp.ge.f32.partialorder %v1462_v9, -1.0 }
  0xe1   :  { %v375_v17 = vpop.f32.mrf.mxu0  ;;  %vm538_vm1 = vcmp.lt.f32.partialorder %v1462_v9, 1.0 }
  0xe2   :  { %v1467_v18 = vadd.f32 %v1221_v12, %v387_v15  ;;  %v386_v19 = vadd.f32 %v375_v17, %v271_v13  ;;  %v1471_v21 = vmul.f32 0.5, %v1102_v16  ;;  %v1476_v22 = vadd.f32 5.0, %v1464_v14  ;;  %vm1498_vm15 = vmand %vm534_vm0, %vm538_vm1 }
  0xe3   :  { %vm533_vm3 = vcmp.ge.f32.partialorder %v1464_v14, -1.0  ;;  %vm537_vm4 = vcmp.lt.f32.partialorder %v1464_v14, 1.0 }
  0xe4   :  { %v1478_v23 = vadd.f32 %v484_v20, %v386_v19  ;;  %v1104_v24 = vadd.f32 5.0, %v1467_v18  ;;  %vm536_vm5 = vcmp.ge.f32.partialorder %v1467_v18, -1.0  ;;  %vm540_vm6 = vcmp.lt.f32.partialorder %v1467_v18, 1.0 }
  0xe5   :  { %vm548_vm7 = vcmp.ge.f32.partialorder %v1467_v18, 1.0  ;;  %vm552_vm8 = vcmp.lt.f32.partialorder %v1467_v18, 3.0  ;;  %vm560_vm9 = vcmp.ge.f32.partialorder %v1467_v18, 3.0  ;;  %vm564_vm10 = vcmp.lt.f32.partialorder %v1467_v18, 5.0  ;;  %vm1502_vm2 = vmand %vm536_vm5, %vm540_vm6 }
  0xe6   :  { %v1489_v25 = vmul.f32 0.5, %v1104_v24  ;;  %v1103_v26 = vadd.f32 5.0, %v1478_v23  ;;  %vm547_vm11 = vcmp.ge.f32.partialorder %v1478_v23, 1.0  ;;  %vm551_vm12 = vcmp.lt.f32.partialorder %v1478_v23, 3.0  ;;  %vm1516_vm0 = vmand %vm548_vm7, %vm552_vm8 }
  0xe7   :  { %vm559_vm13 = vcmp.ge.f32.partialorder %v1478_v23, 3.0  ;;  %vm563_vm14 = vcmp.lt.f32.partialorder %v1478_v23, 5.0  ;;  %vm568_vm5 = vmand %vm560_vm9, %vm564_vm10  ;;  %v1110_v35 = vadd.f32 -2.0, %v1471_v21  ;;  %v614_v36 = vsub.f32 4.0, %v1471_v21 }
  0xe8   :  { %v1112_v30 = vadd.f32 -2.0, %v1489_v25  ;;  %v616_v31 = vsub.f32 4.0, %v1489_v25  ;;  %v1116_v32 = vadd.f32 -3.0, %v1489_v25  ;;  %v636_v33 = vsub.f32 5.0, %v1489_v25 }
  0xe9   :  { %v1529_v34 = vmul.f32 0.5, %v1103_v26  ;;  %v1114_v37 = vadd.f32 -3.0, %v1471_v21  ;;  %vm2034_vm6 = vcmp.lt.f32.partialorder %v1462_v9, 3.0  ;;  %vm2035_vm7 = vcmp.ge.f32.partialorder %v1462_v9, 1.0 }
  0xea   :  { %v612_v38 = vsel %vm1502_vm2, %v1112_v30, 0.0  ;;  %v620_v39 = vsel %vm1516_vm0, %v616_v31, 0.0  ;;  %v632_v40 = vsel %vm1516_vm0, %v1116_v32, 0.0  ;;  %v640_v41 = vsel %vm568_vm5, %v636_v33, 0.0  ;;  %vm1546_vm8 = vmand %vm2035_vm7, %vm2034_vm6 }
  0xeb   :  { %v624_v43 = vadd.f32 %v620_v39, %v612_v38  ;;  %v644_v44 = vadd.f32 %v640_v41, %v632_v40  ;;  %vm2038_vm9 = vcmp.lt.f32.partialorder %v1478_v23, 1.0  ;;  %vm2039_vm10 = vcmp.ge.f32.partialorder %v1478_v23, -1.0  ;;  %vm555_vm0 = vmand %vm547_vm11, %vm551_vm12 }
  0xec   :  { %vm1554_vm1 = vmand %vm2039_vm10, %vm2038_vm9  ;;  %v1111_v46 = vadd.f32 -2.0, %v1529_v34  ;;  %v615_v47 = vsub.f32 4.0, %v1529_v34  ;;  %v1115_v48 = vadd.f32 -3.0, %v1529_v34  ;;  %v635_v49 = vsub.f32 5.0, %v1529_v34 }
  0xed   :  { %v610_v50 = vsel %vm1498_vm15, %v1110_v35, 0.0  ;;  %v618_v51 = vsel %vm1546_vm8, %v614_v36, 0.0  ;;  %v680_v52 = vmul.f32 %v1112_v30, %v624_v43  ;;  %v684_v53 = vmul.f32 %v644_v44, %v636_v33  ;;  %vm567_vm5 = vmand %vm559_vm13, %vm563_vm14 }
  0xee   :  { %v611_v54 = vsel %vm1554_vm1, %v1111_v46, 0.0  ;;  %v619_v55 = vsel %vm555_vm0, %v615_v47, 0.0  ;;  %v631_v57 = vsel %vm555_vm0, %v1115_v48, 0.0  ;;  %v639_v58 = vsel %vm567_vm5, %v635_v49, 0.0  ;;  %vm1599_vm7 = vmand %vm533_vm3, %vm537_vm4 }
  0xef   :  { %v623_v56 = vadd.f32 %v619_v55, %v611_v54  ;;  %v1580_v59 = vadd.f32 %v618_v51, %v610_v50  ;;  %v688_v60 = vadd.f32 %v684_v53, %v680_v52  ;;  %v643_v61 = vadd.f32 %v639_v58, %v631_v57 }
  0xf0   :  { %v630_v62 = vsel %vm1546_vm8, %v1114_v37, 0.0  ;;  %v634_v63 = vsub.f32 5.0, %v1471_v21  ;;  %vm2042_vm11 = vcmp.lt.f32.partialorder %v1462_v9, 5.0  ;;  %vm2043_vm12 = vcmp.ge.f32.partialorder %v1462_v9, 3.0 }
  0xf1   :  { %v679_v0 = vmul.f32 %v1111_v46, %v623_v56  ;;  %vm566_vm13 = vmand %vm2043_vm12, %vm2042_vm11  ;;  %v678_v1 = vmul.f32 %v1110_v35, %v1580_v59  ;;  %v1591_v2 = vmul.f32 0.5, %v1476_v22  ;;  %vm549_vm14 = vcmp.lt.f32.partialorder %v1464_v14, 3.0 }
  0xf2   :  { %v692_v3 = vmul.f32 0.5, %v688_v60  ;;  %v683_v4 = vmul.f32 %v643_v61, %v635_v49  ;;  %v638_v5 = vsel %vm566_vm13, %v634_v63, 0.0  ;;  %vm557_vm6 = vcmp.ge.f32.partialorder %v1464_v14, 3.0 }
  0xf3   :  { %v642_v6 = vadd.f32 %v638_v5, %v630_v62  ;;  %vm561_vm8 = vcmp.lt.f32.partialorder %v1464_v14, 5.0  ;;  %v1109_v8 = vadd.f32 -2.0, %v1591_v2  ;;  %v613_v10 = vsub.f32 4.0, %v1591_v2 }
  0xf4   :  { %1222 = vmatprep.subr.mxu0 %v692_v3  ;;  %v687_v11 = vadd.f32 %v683_v4, %v679_v0  ;;  %vm2046_vm9 = vcmp.ge.f32.partialorder %v1464_v14, 1.0  ;;  %v1113_v12 = vadd.f32 -3.0, %v1591_v2  ;;  %v633_v13 = vsub.f32 5.0, %v1591_v2  ;;  %vm565_vm4 = vmand %vm557_vm6, %vm561_vm8 }
  0xf5   :  { %vm553_vm10 = vmand %vm2046_vm9, %vm549_vm14  ;;  %vm524_vm3 = vcmp.ge.f32.partialorder %v1467_v18, -3.0  ;;  %1223 = vmatpush3.msra.mxu0 %v692_v3  ;;  %v682_v15 = vmul.f32 %v642_v6, %v634_v63  ;;  %v609_v16 = vsel %vm1599_vm7, %v1109_v8, 0.0  ;;  %vm528_vm0 = vcmp.lt.f32.partialorder %v1467_v18, -1.0 }
  0xf6   :  { %v617_v17 = vsel %vm553_vm10, %v613_v10, 0.0  ;;  %v691_v19 = vmul.f32 0.5, %v687_v11  ;;  %v629_v22 = vsel %vm553_vm10, %v1113_v12, 0.0  ;;  %v637_v24 = vsel %vm565_vm4, %v633_v13, 0.0  ;;  %vm1620_vm5 = vmand %vm524_vm3, %vm528_vm0 }
  0xf7   :  { %v621_v20 = vadd.f32 %v617_v17, %v609_v16  ;;  %v686_v26 = vadd.f32 %v682_v15, %v678_v1  ;;  %v641_v29 = vadd.f32 %v637_v24, %v629_v22  ;;  %v1108_v30 = vadd.f32 -1.0, %v1489_v25 }
  0xf8   :  { %v596_v32 = vsub.f32 3.0, %v1489_v25  ;;  %1224 = vmatprep.subr.mxu0 %v691_v19  ;;  %v668_v37 = vmul.f32 %v624_v43, %v616_v31  ;;  %vm523_vm11 = vcmp.ge.f32.partialorder %v1478_v23, -3.0  ;;  %vm527_vm12 = vcmp.lt.f32.partialorder %v1478_v23, -1.0 }
  0xf9   :  { %v677_v33 = vmul.f32 %v1109_v8, %v621_v20  ;;  %1225 = vmatpush3.msra.mxu0 %v691_v19  ;;  %v690_v38 = vmul.f32 0.5, %v686_v26  ;;  %v681_v39 = vmul.f32 %v641_v29, %v633_v13  ;;  %v592_v40 = vsel %vm1620_vm5, %v1108_v30, 0.0  ;;  %vm1636_vm13 = vmand %vm523_vm11, %vm527_vm12 }
  0xfa   :  { %v600_v41 = vsel %vm1502_vm2, %v596_v32, 0.0  ;;  %v1107_v44 = vadd.f32 -1.0, %v1529_v34  ;;  %v595_v46 = vsub.f32 3.0, %v1529_v34  ;;  %v667_v31 = vmul.f32 %v623_v56, %v615_v47 }
  0xfb   :  { %v604_v42 = vadd.f32 %v600_v41, %v592_v40  ;;  %1226 = vmatprep.subr.mxu0 %v690_v38  ;;  %v685_v43 = vadd.f32 %v681_v39, %v677_v33  ;;  %vm522_vm14 = vcmp.ge.f32.partialorder %v1462_v9, -3.0  ;;  %vm526_vm6 = vcmp.lt.f32.partialorder %v1462_v9, -1.0 }
  0xfc   :  { %v1106_v28 = vadd.f32 -1.0, %v1471_v21  ;;  %1227 = vmatpush3.msra.mxu0 %v690_v38  ;;  %v591_v50 = vsel %vm1636_vm13, %v1107_v44, 0.0  ;;  %v599_v47 = vsel %vm1554_vm1, %v595_v46, 0.0  ;;  %vm1647_vm2 = vmand %vm522_vm14, %vm526_vm6  ;;  %v594_v52 = vsub.f32 3.0, %v1471_v21 }
  0xfd   :  { %v664_v49 = vmul.f32 %v1108_v30, %v604_v42  ;;  %v689_v53 = vmul.f32 0.5, %v685_v43  ;;  %v603_v54 = vadd.f32 %v599_v47, %v591_v50  ;;  %v666_v56 = vmul.f32 %v1580_v59, %v614_v36 }
  0xfe   :  { %v590_v55 = vsel %vm1647_vm2, %v1106_v28, 0.0  ;;  %v598_v45 = vsel %vm1498_vm15, %v594_v52, 0.0  ;;  %vm521_vm1 = vcmp.ge.f32.partialorder %v1464_v14, -3.0  ;;  %vm525_vm8 = vcmp.lt.f32.partialorder %v1464_v14, -1.0 }
  0xff   :  { %v672_v57 = vadd.f32 %v668_v37, %v664_v49  ;;  %1228 = vmatprep.subr.mxu0 %v689_v53  ;;  %v663_v58 = vmul.f32 %v1107_v44, %v603_v54  ;;  %v602_v60 = vadd.f32 %v598_v45, %v590_v55  ;;  %v1105_v61 = vadd.f32 -1.0, %v1591_v2  ;;  %vm1663_vm9 = vmand %vm521_vm1, %vm525_vm8 }
 0x100   :  { %v593_v62 = vsub.f32 3.0, %v1591_v2  ;;  %1229 = vmatpush3.msra.mxu0 %v689_v53  ;;  %v665_v27 = vmul.f32 %v621_v20, %v613_v10  ;;  %vm512_vm15 = vcmp.ge.f32.partialorder %v1467_v18, -5.0  ;;  %vm516_vm10 = vcmp.lt.f32.partialorder %v1467_v18, -3.0 }
 0x101   :  { %v676_v63 = vmul.f32 0.5, %v672_v57  ;;  %v671_v36 = vadd.f32 %v667_v31, %v663_v58  ;;  %v662_v59 = vmul.f32 %v1106_v28, %v602_v60  ;;  %v589_v1 = vsel %vm1663_vm9, %v1105_v61, 0.0  ;;  %vm1675_vm3 = vmand %vm512_vm15, %vm516_vm10 }
 0x102   :  { %v597_v3 = vsel %vm1599_vm7, %v593_v62, 0.0  ;;  %v572_v6 = vsel %vm1675_vm3, %v1489_v25, 0.0  ;;  %v576_v8 = vsub.f32 2.0, %v1489_v25  ;;  %v652_v10 = vmul.f32 %v604_v42, %v596_v32 }
 0x103   :  { %1230 = vmatprep.subr.mxu0 %v676_v63  ;;  %v601_v5 = vadd.f32 %v597_v3, %v589_v1  ;;  %v675_v11 = vmul.f32 0.5, %v671_v36  ;;  %v670_v12 = vadd.f32 %v666_v56, %v662_v59  ;;  %vm511_vm4 = vcmp.ge.f32.partialorder %v1478_v23, -5.0 }
 0x104   :  { %1231 = vmatpush3.msra.mxu0 %v676_v63  ;;  %vm515_vm7 = vcmp.lt.f32.partialorder %v1478_v23, -3.0  ;;  %v580_v13 = vsel %vm1620_vm5, %v576_v8, 0.0  ;;  %v575_v15 = vsub.f32 2.0, %v1529_v34  ;;  %v651_v16 = vmul.f32 %v603_v54, %v595_v46  ;;  %v694_v54 = vld [vmem:[%s2015_s2 + $0x8] sm:$0xff] }
 0x105   :  { %v661_v7 = vmul.f32 %v1105_v61, %v601_v5  ;;  %vm519_vm0 = vmand %vm511_vm4, %vm515_vm7  ;;  %1232 = vmatprep.subr.mxu0 %v675_v11  ;;  %v674_v17 = vmul.f32 0.5, %v670_v12  ;;  %v584_v19 = vadd.f32 %v580_v13, %v572_v6  ;;  %vm510_vm11 = vcmp.ge.f32.partialorder %v1462_v9, -5.0 }
 0x106   :  { %v571_v20 = vsel %vm519_vm0, %v1529_v34, 0.0  ;;  %1233 = vmatpush3.msra.mxu0 %v675_v11  ;;  %v579_v24 = vsel %vm1636_vm13, %v575_v15, 0.0  ;;  %vm514_vm12 = vcmp.lt.f32.partialorder %v1462_v9, -3.0  ;;  %v574_v26 = vsub.f32 2.0, %v1471_v21 }
 0x107   :  { %v669_v22 = vadd.f32 %v665_v27, %v661_v7  ;;  %1234 = vmatprep.subr.mxu0 %v674_v17  ;;  %v648_v29 = vmul.f32 %v584_v19, %v1489_v25  ;;  %v583_v30 = vadd.f32 %v579_v24, %v571_v20  ;;  %vm518_vm5 = vmand %vm510_vm11, %vm514_vm12  ;;  %v650_v32 = vmul.f32 %v602_v60, %v594_v52 }
 0x108   :  { %vm509_vm14 = vcmp.ge.f32.partialorder %v1464_v14, -5.0  ;;  %1235 = vmatpush3.msra.mxu0 %v674_v17  ;;  %v570_v35 = vsel %vm518_vm5, %v1471_v21, 0.0  ;;  %v578_v37 = vsel %vm1647_vm2, %v574_v26, 0.0  ;;  %vm513_vm13 = vcmp.lt.f32.partialorder %v1464_v14, -3.0 }
 0x109   :  { %v673_v33 = vmul.f32 0.5, %v669_v22  ;;  %v656_v38 = vadd.f32 %v652_v10, %v648_v29  ;;  %v647_v39 = vmul.f32 %v583_v30, %v1529_v34  ;;  %v582_v40 = vadd.f32 %v578_v37, %v570_v35  ;;  %vm517_vm6 = vmand %vm509_vm14, %vm513_vm13 }
 0x10a   :  { %v573_v25 = vsub.f32 2.0, %v1591_v2  ;;  %v569_v41 = vsel %vm517_vm6, %v1591_v2, 0.0  ;;  %v649_v48 = vmul.f32 %v601_v5, %v593_v62  ;;  %v499_v52 = vmax.f32 %v1478_v23, 0.0 }
 0x10b   :  { %1236 = vmatprep.subr.mxu0 %v673_v33  ;;  %v660_v42 = vmul.f32 0.5, %v656_v38  ;;  %v655_v44 = vadd.f32 %v651_v16, %v647_v39  ;;  %v646_v46 = vmul.f32 %v582_v40, %v1471_v21  ;;  %v500_v21 = vmax.f32 %v1467_v18, 0.0  ;;  %v695_v18 = vld [vmem:[%s2015_s2 + $0x10] sm:$0xff] }
 0x10c   :  { %1237 = vmatpush3.msra.mxu0 %v673_v33  ;;  %v577_v31 = vsel %vm1663_vm9, %v573_v25, 0.0  ;;  %v498_v53 = vmax.f32 %v1462_v9, 0.0  ;;  %v696_v9 = vld [vmem:[%s2015_s2 + $0x18] sm:$0xff]  ;;  %v1320_v23 = vmov 0.0   ;;  %vm1321_vm2 = vmmov 0  }
 0x10d   :  { %v581_v43 = vadd.f32 %v577_v31, %v569_v41  ;;  %1238 = vmatprep.subr.mxu0 %v660_v42  ;;  %v659_v28 = vmul.f32 0.5, %v655_v44  ;;  %v654_v34 = vadd.f32 %v650_v32, %v646_v46  ;;  %1260 = vmatprep.subr.mxu1 %v1320_v23 }
 0x10e   :  { %1239 = vmatpush3.msra.mxu0 %v660_v42  ;;  %1292 = vmatprep.mubr.msk.f32.mxu1 %vm1321_vm2, %v1320_v23 }
 0x10f   :  { %v645_v49 = vmul.f32 %v581_v43, %v1591_v2  ;;  %1240 = vmatprep.subr.mxu0 %v659_v28  ;;  %v658_v50 = vmul.f32 0.5, %v654_v34  ;;  %v497_v2 = vmax.f32 %v1464_v14, 0.0 }
 0x110   :  { %1241 = vmatpush3.msra.mxu0 %v659_v28 }
 0x111   :  { %v653_v47 = vadd.f32 %v649_v48, %v645_v49  ;;  %1242 = vmatprep.subr.mxu0 %v658_v50 }
 0x112   :  { %1243 = vmatpush3.msra.mxu0 %v658_v50 }
 0x113   :  { %v657_v51 = vmul.f32 0.5, %v653_v47 }
 0x115   :  { %1244 = vmatprep.subr.mxu0 %v657_v51 }
 0x116   :  { %1245 = vmatpush3.msra.mxu0 %v657_v51 }
 0x117   :  { %1246 = vmatprep.subr.mxu0 %v500_v21 }
 0x118   :  { %1247 = vmatpush3.msra.mxu0 %v500_v21 }
 0x119   :  { %1248 = vmatprep.subr.mxu0 %v499_v52 }
 0x11a   :  { %1249 = vmatpush3.msra.mxu0 %v499_v52 }
 0x11b   :  { %1250 = vmatprep.subr.mxu0 %v498_v53 }
 0x11c   :  { %1251 = vmatpush3.msra.mxu0 %v498_v53 }
 0x11d   :  { %1252 = vmatprep.subr.mxu0 %v497_v2 }
 0x11e   :  { %1253 = vmatpush3.msra.mxu0 %v497_v2 }
 0x11f   :  { %1255 = vmatmul.mubr.f32.vlgmr.msra.gmra.mxu0 %v694_v54 }
 0x120   :  { %1257 = vmatprep.mubr.f32.mxu0 %v695_v18 }
 0x123   :  { %1258 = vmatmul.mubr.f32.gmra.mxu0 %v696_v9 }
 0x1df   :  { %v1722_v14 = vpop.f32.mrf.mxu0 }
 0x1e0   :  { %v1118_v55 = vadd.f32 5.0, %v1722_v14  ;;  %vm819_vm1 = vcmp.ge.f32.partialorder %v1722_v14, -1.0  ;;  %vm823_vm8 = vcmp.lt.f32.partialorder %v1722_v14, 1.0  ;;  %vm831_vm9 = vcmp.ge.f32.partialorder %v1722_v14, 1.0 }
 0x1e1   :  { %v1725_v56 = vpop.f32.mrf.mxu0  ;;  %vm835_vm15 = vcmp.lt.f32.partialorder %v1722_v14, 3.0  ;;  %vm1760_vm4 = vmand %vm819_vm1, %vm823_vm8 }
 0x1e2   :  { %v1117_v57 = vadd.f32 5.0, %v1725_v56  ;;  %v1729_v45 = vmul.f32 0.5, %v1118_v55  ;;  %vm834_vm13 = vcmp.lt.f32.partialorder %v1725_v56, 3.0  ;;  %vm1774_vm1 = vmand %vm831_vm9, %vm835_vm15  ;;  %vm846_vm15 = vcmp.lt.f32.partialorder %v1725_v56, 5.0 }
 0x1e3   :  { %v1731_v58 = vpop.f32.mrf.mxu0 }
 0x1e4   :  { %v1736_v60 = vmul.f32 0.5, %v1117_v57  ;;  %v1120_v61 = vadd.f32 5.0, %v1731_v58  ;;  %vm821_vm10 = vcmp.ge.f32.partialorder %v1731_v58, -1.0  ;;  %vm825_vm3 = vcmp.lt.f32.partialorder %v1731_v58, 1.0 }
 0x1e5   :  { %v1743_v62 = vpop.f32.mrf.mxu0  ;;  %vm833_vm0 = vcmp.ge.f32.partialorder %v1731_v58, 1.0  ;;  %vm837_vm11 = vcmp.lt.f32.partialorder %v1731_v58, 3.0  ;;  %vm849_vm5 = vcmp.lt.f32.partialorder %v1731_v58, 5.0  ;;  %vm1784_vm8 = vmand %vm821_vm10, %vm825_vm3  ;;  %v1126_v8 = vadd.f32 -2.0, %v1729_v45 }
 0x1e6   :  { %v1751_v63 = vmul.f32 0.5, %v1120_v61  ;;  %v1119_v0 = vadd.f32 5.0, %v1743_v62  ;;  %vm832_vm7 = vcmp.ge.f32.partialorder %v1743_v62, 1.0  ;;  %vm836_vm12 = vcmp.lt.f32.partialorder %v1743_v62, 3.0  ;;  %vm841_vm14 = vmand %vm833_vm0, %vm837_vm11 }
 0x1e7   :  { %vm844_vm6 = vcmp.ge.f32.partialorder %v1743_v62, 3.0  ;;  %vm848_vm2 = vcmp.lt.f32.partialorder %v1743_v62, 5.0  ;;  %v899_v10 = vsub.f32 4.0, %v1729_v45  ;;  %v1130_v11 = vadd.f32 -3.0, %v1729_v45 }
 0x1e8   :  { %v1778_v59 = vmul.f32 0.5, %v1119_v0  ;;  %v1128_v3 = vadd.f32 -2.0, %v1751_v63  ;;  %v901_v4 = vsub.f32 4.0, %v1751_v63  ;;  %v1132_v5 = vadd.f32 -3.0, %v1751_v63 }
 0x1e9   :  { %v921_v6 = vsub.f32 5.0, %v1751_v63  ;;  %vm2063_vm10 = vcmp.ge.f32.partialorder %v1731_v58, 3.0  ;;  %vm2064_vm0 = vcmp.lt.f32.partialorder %v1743_v62, 1.0  ;;  %vm2065_vm11 = vcmp.ge.f32.partialorder %v1743_v62, -1.0 }
 0x1ea   :  { %vm853_vm3 = vmand %vm2063_vm10, %vm849_vm5  ;;  %v897_v12 = vsel %vm1784_vm8, %v1128_v3, 0.0  ;;  %v905_v7 = vsel %vm841_vm14, %v901_v4, 0.0  ;;  %v917_v13 = vsel %vm841_vm14, %v1132_v5, 0.0  ;;  %v1127_v15 = vadd.f32 -2.0, %v1778_v59 }
 0x1eb   :  { %v1810_v16 = vadd.f32 %v905_v7, %v897_v12  ;;  %v925_v17 = vsel %vm853_vm3, %v921_v6, 0.0  ;;  %vm1816_vm9 = vmand %vm2065_vm11, %vm2064_vm0  ;;  %v900_v20 = vsub.f32 4.0, %v1778_v59  ;;  %v1131_v22 = vadd.f32 -3.0, %v1778_v59 }
 0x1ec   :  { %v929_v24 = vadd.f32 %v925_v17, %v917_v13  ;;  %vm840_vm5 = vmand %vm832_vm7, %vm836_vm12  ;;  %v896_v26 = vsel %vm1816_vm9, %v1127_v15, 0.0  ;;  %v920_v29 = vsub.f32 5.0, %v1778_v59  ;;  %v895_v30 = vsel %vm1760_vm4, %v1126_v8, 0.0 }
 0x1ed   :  { %v965_v32 = vmul.f32 %v1128_v3, %v1810_v16  ;;  %vm852_vm14 = vmand %vm844_vm6, %vm848_vm2  ;;  %v904_v33 = vsel %vm840_vm5, %v900_v20, 0.0  ;;  %v916_v35 = vsel %vm840_vm5, %v1131_v22, 0.0  ;;  %v903_v37 = vsel %vm1774_vm1, %v899_v10, 0.0 }
 0x1ee   :  { %v969_v38 = vmul.f32 %v929_v24, %v921_v6  ;;  %v908_v39 = vadd.f32 %v904_v33, %v896_v26  ;;  %v924_v40 = vsel %vm852_vm14, %v920_v29, 0.0  ;;  %v1842_v25 = vadd.f32 %v903_v37, %v895_v30 }
 0x1ef   :  { %v928_v41 = vadd.f32 %v924_v40, %v916_v35  ;;  %vm2068_vm7 = vcmp.lt.f32.partialorder %v1722_v14, 5.0  ;;  %vm2069_vm12 = vcmp.ge.f32.partialorder %v1722_v14, 3.0  ;;  %v915_v42 = vsel %vm1774_vm1, %v1130_v11, 0.0 }
 0x1f0   :  { %vm851_vm6 = vmand %vm2069_vm12, %vm2068_vm7  ;;  %v919_v44 = vsub.f32 5.0, %v1729_v45  ;;  %v1125_v46 = vadd.f32 -2.0, %v1736_v60  ;;  %v973_v31 = vadd.f32 %v969_v38, %v965_v32  ;;  %v964_v43 = vmul.f32 %v1127_v15, %v908_v39 }
 0x1f1   :  { %v963_v48 = vmul.f32 %v1126_v8, %v1842_v25  ;;  %vm2070_vm2 = vcmp.lt.f32.partialorder %v1725_v56, 1.0  ;;  %vm2071_vm10 = vcmp.ge.f32.partialorder %v1725_v56, -1.0  ;;  %v898_v34 = vsub.f32 4.0, %v1736_v60 }
 0x1f2   :  { %vm1857_vm3 = vmand %vm2071_vm10, %vm2070_vm2  ;;  %v968_v49 = vmul.f32 %v928_v41, %v920_v29  ;;  %v923_v50 = vsel %vm851_vm6, %v919_v44, 0.0  ;;  %vm2074_vm1 = vcmp.ge.f32.partialorder %v1725_v56, 1.0  ;;  %v1129_v21 = vadd.f32 -3.0, %v1736_v60 }
 0x1f3   :  { %vm1866_vm0 = vmand %vm2074_vm1, %vm834_vm13  ;;  %v894_v51 = vsel %vm1857_vm3, %v1125_v46, 0.0  ;;  %v977_v52 = vmul.f32 0.5, %v973_v31  ;;  %v927_v53 = vadd.f32 %v923_v50, %v915_v42  ;;  %v918_v54 = vsub.f32 5.0, %v1736_v60 }
 0x1f4   :  { %v902_v2 = vsel %vm1866_vm0, %v898_v34, 0.0  ;;  %v972_v18 = vadd.f32 %v968_v49, %v964_v43  ;;  %vm2077_vm13 = vcmp.ge.f32.partialorder %v1725_v56, 3.0  ;;  %v914_v55 = vsel %vm1866_vm0, %v1129_v21, 0.0 }
 0x1f5   :  { %vm850_vm11 = vmand %vm2077_vm13, %vm846_vm15  ;;  %v1882_v9 = vadd.f32 %v902_v2, %v894_v51  ;;  %vm809_vm5 = vcmp.ge.f32.partialorder %v1731_v58, -3.0  ;;  %1261 = vmatpush3.msra.mxu1 %v977_v52  ;;  %v967_v57 = vmul.f32 %v927_v53, %v919_v44  ;;  %vm813_vm14 = vcmp.lt.f32.partialorder %v1731_v58, -1.0 }
 0x1f6   :  { %v922_v61 = vsel %vm850_vm11, %v918_v54, 0.0  ;;  %v1124_v0 = vadd.f32 -1.0, %v1751_v63  ;;  %1262 = vmatprep.subr.mxu1 %v1320_v23  ;;  %v976_v36 = vmul.f32 0.5, %v972_v18  ;;  %vm1891_vm15 = vmand %vm809_vm5, %vm813_vm14  ;;  %v881_v8 = vsub.f32 3.0, %v1751_v63 }
 0x1f7   :  { %v926_v3 = vadd.f32 %v922_v61, %v914_v55  ;;  %v962_v5 = vmul.f32 %v1125_v46, %v1882_v9  ;;  %v971_v11 = vadd.f32 %v967_v57, %v963_v48  ;;  %vm808_vm7 = vcmp.ge.f32.partialorder %v1743_v62, -3.0 }
 0x1f8   :  { %v877_v12 = vsel %vm1891_vm15, %v1124_v0, 0.0  ;;  %vm807_vm12 = vcmp.ge.f32.partialorder %v1722_v14, -3.0  ;;  %1263 = vmatpush3.msra.mxu1 %v976_v36  ;;  %v885_v13 = vsel %vm1784_vm8, %v881_v8, 0.0  ;;  %vm812_vm6 = vcmp.lt.f32.partialorder %v1743_v62, -1.0 }
 0x1f9   :  { %v966_v7 = vmul.f32 %v926_v3, %v918_v54  ;;  %v1123_v15 = vadd.f32 -1.0, %v1778_v59  ;;  %1264 = vmatprep.subr.mxu1 %v1320_v23  ;;  %v975_v17 = vmul.f32 0.5, %v971_v11  ;;  %v889_v22 = vadd.f32 %v885_v13, %v877_v12  ;;  %vm1910_vm2 = vmand %vm808_vm7, %vm812_vm6 }
 0x1fa   :  { %v953_v24 = vmul.f32 %v1810_v16, %v901_v4  ;;  %v880_v29 = vsub.f32 3.0, %v1778_v59  ;;  %vm811_vm8 = vcmp.lt.f32.partialorder %v1722_v14, -1.0  ;;  %v1122_v32 = vadd.f32 -1.0, %v1729_v45 }
 0x1fb   :  { %v970_v1 = vadd.f32 %v966_v7, %v962_v5  ;;  %v876_v30 = vsel %vm1910_vm2, %v1123_v15, 0.0  ;;  %1265 = vmatpush3.msra.mxu1 %v975_v17  ;;  %v949_v33 = vmul.f32 %v1124_v0, %v889_v22  ;;  %v952_v16 = vmul.f32 %v908_v39, %v900_v20  ;;  %vm1927_vm10 = vmand %vm807_vm12, %vm811_vm8 }
 0x1fc   :  { %v884_v4 = vsel %vm1816_vm9, %v880_v29, 0.0  ;;  %v879_v37 = vsub.f32 3.0, %v1729_v45  ;;  %1266 = vmatprep.subr.mxu1 %v1320_v23  ;;  %v875_v41 = vsel %vm1927_vm10, %v1122_v32, 0.0  ;;  %vm806_vm9 = vcmp.ge.f32.partialorder %v1725_v56, -3.0 }
 0x1fd   :  { %v974_v38 = vmul.f32 0.5, %v970_v1  ;;  %v888_v40 = vadd.f32 %v884_v4, %v876_v30  ;;  %v957_v19 = vadd.f32 %v953_v24, %v949_v33  ;;  %vm810_vm1 = vcmp.lt.f32.partialorder %v1725_v56, -1.0 }
 0x1fe   :  { %v883_v20 = vsel %vm1760_vm4, %v879_v37, 0.0  ;;  %v1121_v39 = vadd.f32 -1.0, %v1736_v60  ;;  %v951_v46 = vmul.f32 %v1842_v25, %v899_v10  ;;  %vm1945_vm0 = vmand %vm806_vm9, %vm810_vm1  ;;  %v878_v43 = vsub.f32 3.0, %v1736_v60 }
 0x1ff   :  { %1267 = vmatpush3.msra.mxu1 %v974_v38  ;;  %v948_v42 = vmul.f32 %v1123_v15, %v888_v40  ;;  %v887_v44 = vadd.f32 %v883_v20, %v875_v41  ;;  %v961_v27 = vmul.f32 0.5, %v957_v19  ;;  %vm797_vm4 = vcmp.ge.f32.partialorder %v1731_v58, -5.0 }
 0x200   :  { %1268 = vmatprep.subr.mxu1 %v1320_v23  ;;  %v874_v48 = vsel %vm1945_vm0, %v1121_v39, 0.0  ;;  %vm801_vm13 = vcmp.lt.f32.partialorder %v1731_v58, -3.0  ;;  %v882_v10 = vsel %vm1857_vm3, %v878_v43, 0.0  ;;  %v861_v25 = vsub.f32 2.0, %v1751_v63 }
 0x201   :  { %v956_v49 = vadd.f32 %v952_v16, %v948_v42  ;;  %v947_v50 = vmul.f32 %v1122_v32, %v887_v44  ;;  %vm805_vm11 = vmand %vm797_vm4, %vm801_vm13  ;;  %1269 = vmatpush3.msra.mxu1 %v961_v27  ;;  %v886_v47 = vadd.f32 %v882_v10, %v874_v48  ;;  %v950_v51 = vmul.f32 %v1882_v9, %v898_v34 }
 0x202   :  { %v857_v21 = vsel %vm805_vm11, %v1751_v63, 0.0  ;;  %vm796_vm5 = vcmp.ge.f32.partialorder %v1743_v62, -5.0  ;;  %1270 = vmatprep.subr.mxu1 %v1320_v23  ;;  %v865_v28 = vsel %vm1891_vm15, %v861_v25, 0.0  ;;  %vm800_vm3 = vcmp.lt.f32.partialorder %v1743_v62, -3.0 }
 0x203   :  { %v960_v52 = vmul.f32 0.5, %v956_v49  ;;  %v955_v53 = vadd.f32 %v951_v46, %v947_v50  ;;  %v946_v2 = vmul.f32 %v1121_v39, %v886_v47  ;;  %v869_v54 = vadd.f32 %v865_v28, %v857_v21  ;;  %vm804_vm14 = vmand %vm796_vm5, %vm800_vm3 }
 0x204   :  { %v937_v18 = vmul.f32 %v889_v22, %v881_v8  ;;  %v860_v34 = vsub.f32 2.0, %v1778_v59  ;;  %v856_v55 = vsel %vm804_vm14, %v1778_v59, 0.0  ;;  %vm795_vm7 = vcmp.ge.f32.partialorder %v1722_v14, -5.0 }
 0x205   :  { %1271 = vmatpush3.msra.mxu1 %v960_v52  ;;  %v959_v9 = vmul.f32 0.5, %v955_v53  ;;  %vm799_vm12 = vcmp.lt.f32.partialorder %v1722_v14, -3.0  ;;  %v954_v57 = vadd.f32 %v950_v51, %v946_v2  ;;  %v933_v61 = vmul.f32 %v869_v54, %v1751_v63 }
 0x206   :  { %1272 = vmatprep.subr.mxu1 %v1320_v23  ;;  %v864_v0 = vsel %vm1910_vm2, %v860_v34, 0.0  ;;  %vm803_vm15 = vmand %vm795_vm7, %vm799_vm12  ;;  %v859_v36 = vsub.f32 2.0, %v1729_v45  ;;  %v936_v5 = vmul.f32 %v888_v40, %v880_v29  ;;  %vm794_vm6 = vcmp.ge.f32.partialorder %v1725_v56, -5.0  ;;  %v978_v40 = vld [vmem:[%s2016_s3] sm:$0x1] }
 0x207   :  { %1273 = vmatpush3.msra.mxu1 %v959_v9  ;;  %v868_v3 = vadd.f32 %v864_v0, %v856_v55  ;;  %v855_v6 = vsel %vm803_vm15, %v1729_v45, 0.0  ;;  %v958_v8 = vmul.f32 0.5, %v954_v57  ;;  %v941_v11 = vadd.f32 %v937_v18, %v933_v61 }
 0x208   :  { %1274 = vmatprep.subr.mxu1 %v1320_v23  ;;  %v863_v63 = vsel %vm1927_vm10, %v859_v36, 0.0  ;;  %vm798_vm2 = vcmp.lt.f32.partialorder %v1725_v56, -3.0  ;;  %v935_v13 = vmul.f32 %v887_v44, %v879_v37  ;;  %v858_v15 = vsub.f32 2.0, %v1736_v60 }
 0x209   :  { %v932_v12 = vmul.f32 %v868_v3, %v1778_v59  ;;  %v867_v7 = vadd.f32 %v863_v63, %v855_v6  ;;  %1275 = vmatpush3.msra.mxu1 %v958_v8  ;;  %v945_v17 = vmul.f32 0.5, %v941_v11  ;;  %vm802_vm8 = vmand %vm794_vm6, %vm798_vm2  ;;  %v934_v1 = vmul.f32 %v886_v47, %v878_v43 }
 0x20a   :  { %1276 = vmatprep.subr.mxu1 %v1320_v23  ;;  %v854_v26 = vsel %vm802_vm8, %v1736_v60, 0.0  ;;  %v862_v29 = vsel %vm1945_vm0, %v858_v15, 0.0  ;;  %v785_v35 = vmax.f32 %v1731_v58, 0.0  ;;  %v784_v37 = vmax.f32 %v1743_v62, 0.0 }
 0x20b   :  { %v940_v22 = vadd.f32 %v936_v5, %v932_v12  ;;  %v931_v24 = vmul.f32 %v867_v7, %v1729_v45  ;;  %1277 = vmatpush3.msra.mxu1 %v945_v17  ;;  %v866_v59 = vadd.f32 %v862_v29, %v854_v26  ;;  %v782_v38 = vmax.f32 %v1725_v56, 0.0 }
 0x20c   :  { %1278 = vmatprep.subr.mxu1 %v1320_v23  ;;  %vm1049_vm10 = vcmask 122880  }
 0x20d   :  { %v944_v30 = vmul.f32 0.5, %v940_v22  ;;  %v939_v32 = vadd.f32 %v935_v13, %v931_v24  ;;  %v930_v33 = vmul.f32 %v866_v59, %v1736_v60  ;;  %v783_v60 = vmax.f32 %v1722_v14, 0.0 }
 0x20f   :  { %1279 = vmatpush3.msra.mxu1 %v944_v30  ;;  %v943_v4 = vmul.f32 0.5, %v939_v32  ;;  %v938_v16 = vadd.f32 %v934_v1, %v930_v33 }
 0x210   :  { %1280 = vmatprep.subr.mxu1 %v1320_v23 }
 0x211   :  { %1281 = vmatpush3.msra.mxu1 %v943_v4  ;;  %v942_v45 = vmul.f32 0.5, %v938_v16 }
 0x212   :  { %1282 = vmatprep.subr.mxu1 %v1320_v23 }
 0x213   :  { %1283 = vmatpush3.msra.mxu1 %v942_v45 }
 0x214   :  { %1284 = vmatprep.subr.mxu1 %v1320_v23 }
 0x215   :  { %1285 = vmatpush3.msra.mxu1 %v785_v35 }
 0x216   :  { %1286 = vmatprep.subr.mxu1 %v1320_v23 }
 0x217   :  { %1287 = vmatpush3.msra.mxu1 %v784_v37 }
 0x218   :  { %1288 = vmatprep.subr.mxu1 %v1320_v23 }
 0x219   :  { %1289 = vmatpush3.msra.mxu1 %v783_v60 }
 0x21a   :  { %1290 = vmatprep.subr.mxu1 %v1320_v23 }
 0x21b   :  { %1291 = vmatpush3.msra.mxu1 %v782_v38 }
 0x21c   :  { %1293 = vmatmul.mubr.f32.vlgmr.msra.gmra.mxu1 %v978_v40 }
 0x2dc   :  { %v1045_v58 = vpop.f32.mrf.mxu1 }
 0x2dd   :  { %1050 = vst.msk [vmem:[#allocation2] sm:$0x1] %vm1049_vm10, %v1045_v58 }
 0x2de   :  { %v1294_v14 = vpop.f32.mrf.mxu1 }
 0x2df   :  { %1309 = shalt.err (!%p1306_p4)
}
 0x2e0   :  { %1060 = dma.vmem_to_hbm [thread:$0]  %s1058_s30, 16, %s2017_s4, [#allocation3]  }
 0x2e1   :  { %1318 = dma.done.wait [#allocation3], 16  }
 0x2e2   :  { %1319 = vsyncadd [#allocation3], 4294967280 }
 0x2e3   :  { %1064 = vsyncpa [#allocation3], 1 }

</bundles_post_ra>
